<compile_context>
chip_gen: v5e
topology: v5e:2x2
jax: 0.10.0
libtpu: 0.0.40
codegen_flags: <defaults>
</compile_context>

<pallas_src>
import jax
import jax.numpy as jnp
from jax.experimental import pallas as pl
from jax.experimental.pallas import tpu as pltpu


def _round_up(a: int, b: int) -> int:
    return (a + b - 1) // b * b


# ---------------------------------------------------------------------------
# Pass 1: conv (matmul) + per-channel sum/sumsq + running window max/min.
# Grid = (num_m_tiles [parallel], 8 pool-window positions [arbitrary, innermost]).
# ---------------------------------------------------------------------------
def conv_stats_kernel(x_ref, w_ref, ymax_ref, ymin_ref, stats_ref,
                      max_scr, min_scr, sum_scr, sq_scr):
    j = pl.program_id(1)
    n_win = pl.num_programs(1)

    # conv as matmul on the MXU: bf16 inputs, f32 accumulation (no HIGHEST).
    y = jnp.dot(x_ref[0], w_ref[...], preferred_element_type=jnp.float32)

    @pl.when(j == 0)
    def _():
        max_scr[...] = y
        min_scr[...] = y
        sum_scr[...] = jnp.zeros_like(sum_scr)
        sq_scr[...] = jnp.zeros_like(sq_scr)

    @pl.when(j > 0)
    def _():
        max_scr[...] = jnp.maximum(max_scr[...], y)
        min_scr[...] = jnp.minimum(min_scr[...], y)

    # Per-channel batch-norm statistics (f32 accumulators). Zero-padded rows /
    # columns contribute exactly zero, so the true voxel count is the divisor.
    sum_scr[...] = sum_scr[...] + jnp.sum(y, axis=0, keepdims=True)
    sq_scr[...] = sq_scr[...] + jnp.sum(y * y, axis=0, keepdims=True)

    @pl.when(j == n_win - 1)
    def _():
        ymax_ref[...] = max_scr[...]
        ymin_ref[...] = min_scr[...]
        c = sum_scr.shape[-1]
        stats_ref[0] = jnp.concatenate(
            [sum_scr[...], sq_scr[...], jnp.zeros((6, c), jnp.float32)], axis=0)


# ---------------------------------------------------------------------------
# Pass 2: BN affine + ReLU + pool selection (per-channel monotone affine =>
# pooled max over the 8 window positions is recovered from window max/min).
# ---------------------------------------------------------------------------
def bn_relu_pool_kernel(ymax_ref, ymin_ref, scale_ref, shift_ref, o_ref):
    s = scale_ref[...]          # (1, C_pad)
    t = shift_ref[...]          # (1, C_pad)
    hi = jnp.maximum(ymax_ref[...] * s, ymin_ref[...] * s)
    o_ref[...] = jnp.maximum(hi + t, 0.0)


def reslayer_forward(x, conv_w, conv_b, gamma, beta, eps=1e-5, tile_m=512):
    """x: (N, Cin, D, H, W) float32 (PyTorch NCDHW). Returns (N, Cout, D//2, H//2, W//2)."""
    N, Cin, D, H, W = x.shape
    Cout = conv_w.shape[0]
    assert D % 2 == 0 and H % 2 == 0 and W % 2 == 0
    del conv_b  # BN mean subtraction cancels a per-channel constant shift exactly.

    Do, Ho, Wo = D // 2, H // 2, W // 2
    Mo = N * Do * Ho * Wo
    K = 27 * Cin
    n_win = 8

    LANE = 128
    K_pad = _round_up(K, LANE)
    C_pad = _round_up(Cout, LANE)
    tile_m = min(tile_m, _round_up(Mo, 8))
    Mo_pad = _round_up(Mo, tile_m)
    n_tiles = Mo_pad // tile_m

    # --- glue: layout conversion + im2col + pool-window grouping (plain JAX, bf16) ---
    x_ndhwc = jnp.transpose(x, (0, 2, 3, 4, 1)).astype(jnp.float32)
    x_p = jnp.pad(x_ndhwc, ((0, 0), (1, 1), (1, 1), (1, 1), (0, 0))).astype(jnp.bfloat16)
    cols = []
    for kd in range(3):
        for kh in range(3):
            for kw in range(3):
                cols.append(x_p[:, kd:kd + D, kh:kh + H, kw:kw + W, :])
    xc = jnp.concatenate(cols, axis=-1)                       # (N, D, H, W, 27*Cin)
    xc = xc.reshape(N, Do, 2, Ho, 2, Wo, 2, K)
    xc = jnp.transpose(xc, (2, 4, 6, 0, 1, 3, 5, 7))          # (2,2,2, N,Do,Ho,Wo, K)
    xc = xc.reshape(n_win, Mo, K)
    xc = jnp.pad(xc, ((0, 0), (0, Mo_pad - Mo), (0, K_pad - K)))

    # PyTorch conv weight (Cout, Cin, kd, kh, kw) -> (K_pad, C_pad), zero-padded, bf16.
    w_mat = jnp.transpose(conv_w, (2, 3, 4, 1, 0)).reshape(K, Cout)
    w_mat = jnp.pad(w_mat, ((0, K_pad - K), (0, C_pad - Cout))).astype(jnp.bfloat16)

    cparams1 = pltpu.CompilerParams(
        dimension_semantics=("parallel", "arbitrary"),
        vmem_limit_bytes=32 * 1024 * 1024)

    ymax, ymin, pstats = pl.pallas_call(
        conv_stats_kernel,
        out_shape=(
            jax.ShapeDtypeStruct((Mo_pad, C_pad), jnp.float32),
            jax.ShapeDtypeStruct((Mo_pad, C_pad), jnp.float32),
            jax.ShapeDtypeStruct((n_tiles, 8, C_pad), jnp.float32),
        ),
        grid_spec=pltpu.PrefetchScalarGridSpec(
            num_scalar_prefetch=0,
            grid=(n_tiles, n_win),
            in_specs=[
                pl.BlockSpec((1, tile_m, K_pad), lambda m, j: (j, m, 0)),
                pl.BlockSpec((K_pad, C_pad), lambda m, j: (0, 0)),
            ],
            out_specs=[
                pl.BlockSpec((tile_m, C_pad), lambda m, j: (m, 0)),
                pl.BlockSpec((tile_m, C_pad), lambda m, j: (m, 0)),
                pl.BlockSpec((1, 8, C_pad), lambda m, j: (m, 0, 0)),
            ],
            scratch_shapes=[
                pltpu.VMEM((tile_m, C_pad), jnp.float32),
                pltpu.VMEM((tile_m, C_pad), jnp.float32),
                pltpu.VMEM((1, C_pad), jnp.float32),
                pltpu.VMEM((1, C_pad), jnp.float32),
            ],
        ),
        compiler_params=cparams1,
    )(xc, w_mat)

    # --- tiny cross-tile stats reduction + scale/shift (plain JAX glue) ---
    m_total = jnp.float32(N * D * H * W)
    sums = jnp.sum(pstats[:, 0, :], axis=0)
    sqs = jnp.sum(pstats[:, 1, :], axis=0)
    mean = sums / m_total
    var = sqs / m_total - mean * mean
    gamma_p = jnp.pad(gamma.astype(jnp.float32), (0, C_pad - Cout))
    beta_p = jnp.pad(beta.astype(jnp.float32), (0, C_pad - Cout))
    scale = gamma_p * jax.lax.rsqrt(var + eps)
    shift = beta_p - mean * scale
    scale2 = scale.reshape(1, C_pad)
    shift2 = shift.reshape(1, C_pad)

    out_pad = pl.pallas_call(
        bn_relu_pool_kernel,
        out_shape=jax.ShapeDtypeStruct((Mo_pad, C_pad), jnp.float32),
        grid=(n_tiles,),
        in_specs=[
            pl.BlockSpec((tile_m, C_pad), lambda m: (m, 0)),
            pl.BlockSpec((tile_m, C_pad), lambda m: (m, 0)),
            pl.BlockSpec((1, C_pad), lambda m: (0, 0)),
            pl.BlockSpec((1, C_pad), lambda m: (0, 0)),
        ],
        out_specs=pl.BlockSpec((tile_m, C_pad), lambda m: (m, 0)),
        compiler_params=pltpu.CompilerParams(
            dimension_semantics=("parallel",),
            vmem_limit_bytes=32 * 1024 * 1024),
    )(ymax, ymin, scale2, shift2)

    out = out_pad[:Mo, :Cout].reshape(N, Do, Ho, Wo, Cout)
    return jnp.transpose(out, (0, 4, 1, 2, 3))                # back to NCDHW


def reference_forward(x, conv_w, conv_b, gamma, beta, eps=1e-5):
    """Pure-JAX f32 reference of the same forward (correctness check)."""
    y = jax.lax.conv_general_dilated(
        x, conv_w, window_strides=(1, 1, 1),
        padding=((1, 1), (1, 1), (1, 1)),
        dimension_numbers=("NCDHW", "OIDHW", "NCDHW"),
        precision=jax.lax.Precision.HIGHEST)
    y = y + conv_b.reshape(1, -1, 1, 1, 1)
    mean = jnp.mean(y, axis=(0, 2, 3, 4), keepdims=True)
    var = jnp.mean((y - mean) ** 2, axis=(0, 2, 3, 4), keepdims=True)
    y = (y - mean) * jax.lax.rsqrt(var + eps)
    y = y * gamma.reshape(1, -1, 1, 1, 1) + beta.reshape(1, -1, 1, 1, 1)
    y = jnp.maximum(y, 0.0)
    y = jax.lax.reduce_window(y, -jnp.inf, jax.lax.max,
                              window_dimensions=(1, 1, 2, 2, 2),
                              window_strides=(1, 1, 2, 2, 2),
                              padding="VALID")
    return y


if __name__ == "__main__":
    # small shapes consistent with ResLayer(in_ch=4, out_ch=8) on a 3-D volume
    N, Cin, Cout = 2, 4, 8
    D = H = W = 8

    key = jax.random.PRNGKey(0)
    k_x, k_w, k_b, k_g, k_be = jax.random.split(key, 5)
    x = jax.random.normal(k_x, (N, Cin, D, H, W), dtype=jnp.float32)
    conv_w = 0.1 * jax.random.normal(k_w, (Cout, Cin, 3, 3, 3), dtype=jnp.float32)
    conv_b = 0.1 * jax.random.normal(k_b, (Cout,), dtype=jnp.float32)
    # mixed-sign gamma so both the max (scale>0) and min (scale<0) pooling paths run
    gamma = (1.0 + 0.1 * jax.random.normal(k_g, (Cout,), dtype=jnp.float32))
    gamma = gamma * jnp.where(jnp.arange(Cout) % 2 == 0, 1.0, -1.0)
    beta = 0.1 * jax.random.normal(k_be, (Cout,), dtype=jnp.float32)

    out = jax.jit(reslayer_forward)(x, conv_w, conv_b, gamma, beta)
    out = jax.block_until_ready(out)

    ref = reference_forward(x, conv_w, conv_b, gamma, beta)
    assert out.shape == (N, Cout, D // 2, H // 2, W // 2), out.shape
    err = float(jnp.max(jnp.abs(out - ref)))
    # tolerance reflects bf16 MXU inputs (f32 accumulation) vs an f32 HIGHEST reference
    assert jnp.allclose(out, ref, atol=2e-2, rtol=2e-2), err

    print("KERNEL_OK")
</pallas_src>

<mosaic_0001>
module attributes {stable_mosaic.version = 11 : i64} {
  func.func @conv_stats_kernel(%arg0: i32, %arg1: i32, %arg2: memref<1x128x128xbf16, #tpu.memory_space<vmem>>, %arg3: memref<128x128xbf16, #tpu.memory_space<vmem>>, %arg4: memref<128x128xf32, #tpu.memory_space<vmem>>, %arg5: memref<128x128xf32, #tpu.memory_space<vmem>>, %arg6: memref<1x8x128xf32, #tpu.memory_space<vmem>>, %arg7: memref<128x128xf32, #tpu.memory_space<vmem>>, %arg8: memref<128x128xf32, #tpu.memory_space<vmem>>, %arg9: memref<1x128xf32, #tpu.memory_space<vmem>>, %arg10: memref<1x128xf32, #tpu.memory_space<vmem>>) attributes {dimension_semantics = [#tpu.dimension_semantics<parallel>, #tpu.dimension_semantics<arbitrary>], iteration_bounds = array<i64: 1, 8>, scalar_prefetch = 0 : i64, scratch_operands = 4 : i64, tpu.core_type = #tpu.core_type<tc>, window_params = [{transform_indices = @transform_0, window_bounds = array<i64: 1, 128, 128>}, {pipeline_mode = #tpu.pipeline_mode<synchronous>, transform_indices = @transform_1, window_bounds = array<i64: 128, 128>}, {transform_indices = @transform_2, window_bounds = array<i64: 128, 128>}, {transform_indices = @transform_3, window_bounds = array<i64: 128, 128>}, {transform_indices = @transform_4, window_bounds = array<i64: 1, 8, 128>}]} {
    %c0 = arith.constant 0 : index
    %c0_0 = arith.constant 0 : index
    %c0_1 = arith.constant 0 : index
    %0 = vector.load %arg2[%c0, %c0_0, %c0_1] : memref<1x128x128xbf16, #tpu.memory_space<vmem>>, vector<1x128x128xbf16>
    %1 = vector.shape_cast %0 : vector<1x128x128xbf16> to vector<128x128xbf16>
    %c0_2 = arith.constant 0 : index
    %c0_3 = arith.constant 0 : index
    %2 = vector.load %arg3[%c0_2, %c0_3] : memref<128x128xbf16, #tpu.memory_space<vmem>>, vector<128x128xbf16>
    %cst = arith.constant dense<0.000000e+00> : vector<128x128xf32>
    %3 = tpu.matmul %1, %2, %cst {dimension_numbers = #tpu.dot_dimension_numbers<[1], [0], [0], [1], [0, 0, 1, 1], [], []>} : vector<128x128xbf16>, vector<128x128xbf16>, vector<128x128xf32> -> vector<128x128xf32>
    %c0_i32 = arith.constant 0 : i32
    %4 = arith.cmpi eq, %arg1, %c0_i32 : i32
    %5 = arith.extui %4 : i1 to i32
    %c0_i32_4 = arith.constant 0 : i32
    %6 = arith.cmpi ne, %5, %c0_i32_4 : i32
    scf.if %6 {
      %c0_18 = arith.constant 0 : index
      %c0_19 = arith.constant 0 : index
      %24 = vector.load %arg7[%c0_18, %c0_19] : memref<128x128xf32, #tpu.memory_space<vmem>>, vector<128x128xf32>
      tpu.vector_store %arg7[%c0_18, %c0_19], %3 {strides = array<i32>} : memref<128x128xf32, #tpu.memory_space<vmem>>, vector<128x128xf32>,
      %c0_20 = arith.constant 0 : index
      %c0_21 = arith.constant 0 : index
      %25 = vector.load %arg8[%c0_20, %c0_21] : memref<128x128xf32, #tpu.memory_space<vmem>>, vector<128x128xf32>
      tpu.vector_store %arg8[%c0_20, %c0_21], %3 {strides = array<i32>} : memref<128x128xf32, #tpu.memory_space<vmem>>, vector<128x128xf32>,
      %cst_22 = arith.constant 0.000000e+00 : f32
      %26 = vector.broadcast %cst_22 : f32 to vector<1x128xf32>
      %c0_23 = arith.constant 0 : index
      %c0_24 = arith.constant 0 : index
      %27 = vector.load %arg9[%c0_23, %c0_24] : memref<1x128xf32, #tpu.memory_space<vmem>>, vector<1x128xf32>
      tpu.vector_store %arg9[%c0_23, %c0_24], %26 {strides = array<i32>} : memref<1x128xf32, #tpu.memory_space<vmem>>, vector<1x128xf32>,
      %cst_25 = arith.constant 0.000000e+00 : f32
      %28 = vector.broadcast %cst_25 : f32 to vector<1x128xf32>
      %c0_26 = arith.constant 0 : index
      %c0_27 = arith.constant 0 : index
      %29 = vector.load %arg10[%c0_26, %c0_27] : memref<1x128xf32, #tpu.memory_space<vmem>>, vector<1x128xf32>
      tpu.vector_store %arg10[%c0_26, %c0_27], %28 {strides = array<i32>} : memref<1x128xf32, #tpu.memory_space<vmem>>, vector<1x128xf32>,
    } else {
    }
    %c0_i32_5 = arith.constant 0 : i32
    %7 = arith.cmpi sgt, %arg1, %c0_i32_5 : i32
    %8 = arith.extui %7 : i1 to i32
    %c0_i32_6 = arith.constant 0 : i32
    %9 = arith.cmpi ne, %8, %c0_i32_6 : i32
    scf.if %9 {
      %c0_18 = arith.constant 0 : index
      %c0_19 = arith.constant 0 : index
      %24 = vector.load %arg7[%c0_18, %c0_19] : memref<128x128xf32, #tpu.memory_space<vmem>>, vector<128x128xf32>
      %25 = arith.maximumf %24, %3 : vector<128x128xf32>
      %c0_20 = arith.constant 0 : index
      %c0_21 = arith.constant 0 : index
      %26 = vector.load %arg7[%c0_20, %c0_21] : memref<128x128xf32, #tpu.memory_space<vmem>>, vector<128x128xf32>
      tpu.vector_store %arg7[%c0_20, %c0_21], %25 {strides = array<i32>} : memref<128x128xf32, #tpu.memory_space<vmem>>, vector<128x128xf32>,
      %c0_22 = arith.constant 0 : index
      %c0_23 = arith.constant 0 : index
      %27 = vector.load %arg8[%c0_22, %c0_23] : memref<128x128xf32, #tpu.memory_space<vmem>>, vector<128x128xf32>
      %28 = arith.minimumf %27, %3 : vector<128x128xf32>
      %c0_24 = arith.constant 0 : index
      %c0_25 = arith.constant 0 : index
      %29 = vector.load %arg8[%c0_24, %c0_25] : memref<128x128xf32, #tpu.memory_space<vmem>>, vector<128x128xf32>
      tpu.vector_store %arg8[%c0_24, %c0_25], %28 {strides = array<i32>} : memref<128x128xf32, #tpu.memory_space<vmem>>, vector<128x128xf32>,
    } else {
    }
    %c0_7 = arith.constant 0 : index
    %c0_8 = arith.constant 0 : index
    %10 = vector.load %arg9[%c0_7, %c0_8] : memref<1x128xf32, #tpu.memory_space<vmem>>, vector<1x128xf32>
    %cst_9 = arith.constant dense<0.000000e+00> : vector<128xf32>
    %11 = vector.multi_reduction <add>, %3, %cst_9 [0] : vector<128x128xf32> to vector<128xf32>
    %12 = vector.shape_cast %11 : vector<128xf32> to vector<1x128xf32>
    %13 = arith.addf %10, %12 : vector<1x128xf32>
    %c0_10 = arith.constant 0 : index
    %c0_11 = arith.constant 0 : index
    %14 = vector.load %arg9[%c0_10, %c0_11] : memref<1x128xf32, #tpu.memory_space<vmem>>, vector<1x128xf32>
    tpu.vector_store %arg9[%c0_10, %c0_11], %13 {strides = array<i32>} : memref<1x128xf32, #tpu.memory_space<vmem>>, vector<1x128xf32>,
    %c0_12 = arith.constant 0 : index
    %c0_13 = arith.constant 0 : index
    %15 = vector.load %arg10[%c0_12, %c0_13] : memref<1x128xf32, #tpu.memory_space<vmem>>, vector<1x128xf32>
    %16 = arith.mulf %3, %3 : vector<128x128xf32>
    %cst_14 = arith.constant dense<0.000000e+00> : vector<128xf32>
    %17 = vector.multi_reduction <add>, %16, %cst_14 [0] : vector<128x128xf32> to vector<128xf32>
    %18 = vector.shape_cast %17 : vector<128xf32> to vector<1x128xf32>
    %19 = arith.addf %15, %18 : vector<1x128xf32>
    %c0_15 = arith.constant 0 : index
    %c0_16 = arith.constant 0 : index
    %20 = vector.load %arg10[%c0_15, %c0_16] : memref<1x128xf32, #tpu.memory_space<vmem>>, vector<1x128xf32>
    tpu.vector_store %arg10[%c0_15, %c0_16], %19 {strides = array<i32>} : memref<1x128xf32, #tpu.memory_space<vmem>>, vector<1x128xf32>,
    %c7_i32 = arith.constant 7 : i32
    %21 = arith.cmpi eq, %arg1, %c7_i32 : i32
    %22 = arith.extui %21 : i1 to i32
    %c0_i32_17 = arith.constant 0 : i32
    %23 = arith.cmpi ne, %22, %c0_i32_17 : i32
    scf.if %23 {
      %c0_18 = arith.constant 0 : index
      %c0_19 = arith.constant 0 : index
      %24 = vector.load %arg7[%c0_18, %c0_19] : memref<128x128xf32, #tpu.memory_space<vmem>>, vector<128x128xf32>
      %c0_20 = arith.constant 0 : index
      %c0_21 = arith.constant 0 : index
      %25 = vector.load %arg4[%c0_20, %c0_21] : memref<128x128xf32, #tpu.memory_space<vmem>>, vector<128x128xf32>
      tpu.vector_store %arg4[%c0_20, %c0_21], %24 {strides = array<i32>} : memref<128x128xf32, #tpu.memory_space<vmem>>, vector<128x128xf32>,
      %c0_22 = arith.constant 0 : index
      %c0_23 = arith.constant 0 : index
      %26 = vector.load %arg8[%c0_22, %c0_23] : memref<128x128xf32, #tpu.memory_space<vmem>>, vector<128x128xf32>
      %c0_24 = arith.constant 0 : index
      %c0_25 = arith.constant 0 : index
      %27 = vector.load %arg5[%c0_24, %c0_25] : memref<128x128xf32, #tpu.memory_space<vmem>>, vector<128x128xf32>
      tpu.vector_store %arg5[%c0_24, %c0_25], %26 {strides = array<i32>} : memref<128x128xf32, #tpu.memory_space<vmem>>, vector<128x128xf32>,
      %c0_26 = arith.constant 0 : index
      %c0_27 = arith.constant 0 : index
      %28 = vector.load %arg9[%c0_26, %c0_27] : memref<1x128xf32, #tpu.memory_space<vmem>>, vector<1x128xf32>
      %c0_28 = arith.constant 0 : index
      %c0_29 = arith.constant 0 : index
      %29 = vector.load %arg10[%c0_28, %c0_29] : memref<1x128xf32, #tpu.memory_space<vmem>>, vector<1x128xf32>
      %cst_30 = arith.constant 0.000000e+00 : f32
      %30 = vector.broadcast %cst_30 : f32 to vector<6x128xf32>
      %31 = tpu.concatenate %28, %29, %30 in 0 : vector<1x128xf32>, vector<1x128xf32>, vector<6x128xf32> -> vector<8x128xf32>
      %c0_31 = arith.constant 0 : index
      %c0_32 = arith.constant 0 : index
      %c0_33 = arith.constant 0 : index
      %32 = vector.load %arg6[%c0_31, %c0_32, %c0_33] : memref<1x8x128xf32, #tpu.memory_space<vmem>>, vector<1x8x128xf32>
      %33 = vector.shape_cast %32 : vector<1x8x128xf32> to vector<8x128xf32>
      %34 = vector.shape_cast %31 : vector<8x128xf32> to vector<1x8x128xf32>
      tpu.vector_store %arg6[%c0_31, %c0_32, %c0_33], %34 {strides = array<i32>} : memref<1x8x128xf32, #tpu.memory_space<vmem>>, vector<1x8x128xf32>,
    } else {
    }
    return
  }
  func.func @transform_0(%arg0: i32, %arg1: i32) -> (i32, i32, i32) {
    %c0_i32 = arith.constant 0 : i32
    %c0_i32_0 = arith.constant 0 : i32
    return %arg1, %arg0, %c0_i32 : i32, i32, i32
  }
  func.func @transform_1(%arg0: i32, %arg1: i32) -> (i32, i32) {
    %c0_i32 = arith.constant 0 : i32
    %c0_i32_0 = arith.constant 0 : i32
    %c0_i32_1 = arith.constant 0 : i32
    return %c0_i32, %c0_i32_0 : i32, i32
  }
  func.func @transform_2(%arg0: i32, %arg1: i32) -> (i32, i32) {
    %c0_i32 = arith.constant 0 : i32
    %c0_i32_0 = arith.constant 0 : i32
    return %arg0, %c0_i32 : i32, i32
  }
  func.func @transform_3(%arg0: i32, %arg1: i32) -> (i32, i32) {
    %c0_i32 = arith.constant 0 : i32
    %c0_i32_0 = arith.constant 0 : i32
    return %arg0, %c0_i32 : i32, i32
  }
  func.func @transform_4(%arg0: i32, %arg1: i32) -> (i32, i32, i32) {
    %c0_i32 = arith.constant 0 : i32
    %c0_i32_0 = arith.constant 0 : i32
    %c0_i32_1 = arith.constant 0 : i32
    return %arg0, %c0_i32, %c0_i32_0 : i32, i32, i32
  }
}

module attributes {stable_mosaic.version = 11 : i64} {
  func.func @bn_relu_pool_kernel(%arg0: i32, %arg1: memref<128x128xf32, #tpu.memory_space<vmem>>, %arg2: memref<128x128xf32, #tpu.memory_space<vmem>>, %arg3: memref<1x128xf32, #tpu.memory_space<vmem>>, %arg4: memref<1x128xf32, #tpu.memory_space<vmem>>, %arg5: memref<128x128xf32, #tpu.memory_space<vmem>>) attributes {dimension_semantics = [#tpu.dimension_semantics<parallel>], iteration_bounds = array<i64: 1>, scalar_prefetch = 0 : i64, scratch_operands = 0 : i64, tpu.core_type = #tpu.core_type<tc>, window_params = [{transform_indices = @transform_0, window_bounds = array<i64: 128, 128>}, {transform_indices = @transform_1, window_bounds = array<i64: 128, 128>}, {pipeline_mode = #tpu.pipeline_mode<synchronous>, transform_indices = @transform_2, window_bounds = array<i64: 1, 128>}, {pipeline_mode = #tpu.pipeline_mode<synchronous>, transform_indices = @transform_3, window_bounds = array<i64: 1, 128>}, {transform_indices = @transform_4, window_bounds = array<i64: 128, 128>}]} {
    %c0 = arith.constant 0 : index
    %c0_0 = arith.constant 0 : index
    %0 = vector.load %arg3[%c0, %c0_0] : memref<1x128xf32, #tpu.memory_space<vmem>>, vector<1x128xf32>
    %c0_1 = arith.constant 0 : index
    %c0_2 = arith.constant 0 : index
    %1 = vector.load %arg4[%c0_1, %c0_2] : memref<1x128xf32, #tpu.memory_space<vmem>>, vector<1x128xf32>
    %c0_3 = arith.constant 0 : index
    %c0_4 = arith.constant 0 : index
    %2 = vector.load %arg1[%c0_3, %c0_4] : memref<128x128xf32, #tpu.memory_space<vmem>>, vector<128x128xf32>
    %3 = vector.broadcast %0 : vector<1x128xf32> to vector<128x128xf32>
    %4 = arith.mulf %2, %3 : vector<128x128xf32>
    %c0_5 = arith.constant 0 : index
    %c0_6 = arith.constant 0 : index
    %5 = vector.load %arg2[%c0_5, %c0_6] : memref<128x128xf32, #tpu.memory_space<vmem>>, vector<128x128xf32>
    %6 = vector.broadcast %0 : vector<1x128xf32> to vector<128x128xf32>
    %7 = arith.mulf %5, %6 : vector<128x128xf32>
    %8 = arith.maximumf %4, %7 : vector<128x128xf32>
    %9 = vector.broadcast %1 : vector<1x128xf32> to vector<128x128xf32>
    %10 = arith.addf %8, %9 : vector<128x128xf32>
    %cst = arith.constant 0.000000e+00 : f32
    %11 = vector.broadcast %cst : f32 to vector<128x128xf32>
    %12 = arith.maximumf %10, %11 : vector<128x128xf32>
    %c0_7 = arith.constant 0 : index
    %c0_8 = arith.constant 0 : index
    %13 = vector.load %arg5[%c0_7, %c0_8] : memref<128x128xf32, #tpu.memory_space<vmem>>, vector<128x128xf32>
    tpu.vector_store %arg5[%c0_7, %c0_8], %12 {strides = array<i32>} : memref<128x128xf32, #tpu.memory_space<vmem>>, vector<128x128xf32>,
    return
  }
  func.func @transform_0(%arg0: i32) -> (i32, i32) {
    %c0_i32 = arith.constant 0 : i32
    %c0_i32_0 = arith.constant 0 : i32
    return %arg0, %c0_i32 : i32, i32
  }
  func.func @transform_1(%arg0: i32) -> (i32, i32) {
    %c0_i32 = arith.constant 0 : i32
    %c0_i32_0 = arith.constant 0 : i32
    return %arg0, %c0_i32 : i32, i32
  }
  func.func @transform_2(%arg0: i32) -> (i32, i32) {
    %c0_i32 = arith.constant 0 : i32
    %c0_i32_0 = arith.constant 0 : i32
    %c0_i32_1 = arith.constant 0 : i32
    return %c0_i32, %c0_i32_0 : i32, i32
  }
  func.func @transform_3(%arg0: i32) -> (i32, i32) {
    %c0_i32 = arith.constant 0 : i32
    %c0_i32_0 = arith.constant 0 : i32
    %c0_i32_1 = arith.constant 0 : i32
    return %c0_i32, %c0_i32_0 : i32, i32
  }
  func.func @transform_4(%arg0: i32) -> (i32, i32) {
    %c0_i32 = arith.constant 0 : i32
    %c0_i32_0 = arith.constant 0 : i32
    return %arg0, %c0_i32 : i32, i32
  }
}

</mosaic_0001>

<bundles_post_ra>
// kernel: reslayer_forward.3
= control target key start
LH: loop header
LB: loop body
LE: loop exit
PB: predicated region body
PF: predicated region fallthrough
CT: control target
= control target key end

     0   :  { %s388_s0 = inlined_call_operand.vmem [shape: f32[128,128], index: 0, kind: input, shape index: {}]   ;;  %s389_s1 = inlined_call_operand.vmem [shape: f32[128,128], index: 1, kind: input, shape index: {}]   ;;  %s390_s2 = inlined_call_operand.vmem [shape: f32[1,128], index: 2, kind: input, shape index: {}]   ;;  %s391_s3 = inlined_call_operand.vmem [shape: f32[1,128], index: 3, kind: input, shape index: {}]   ;;  %s392_s4 = inlined_call_operand.hbm [shape: f32[128,128], index: 4, kind: output, shape index: {}]  }
   0x1   :  { %v20_v0 = vld [vmem:[%s388_s0] sm:$0xff]  ;;  %v21_v4 = vld [vmem:[%s388_s0 + $0x8] sm:$0xff]  ;;  %v22_v6 = vld [vmem:[%s388_s0 + $0x10] sm:$0xff] }
   0x2   :  { %v237_v1 = vld [vmem:[%s390_s2] ss:$0 sm:$0xff]  ;;  %v56_v5 = vld [vmem:[%s389_s1 + $0x8] sm:$0xff]  ;;  %v57_v11 = vld [vmem:[%s389_s1 + $0x10] sm:$0xff] }
   0x3   :  { %v55_v2 = vld [vmem:[%s389_s1] sm:$0xff]  ;;  %v39_v7 = vmul.f32 %v237_v1, %v20_v0  ;;  %v40_v9 = vmul.f32 %v237_v1, %v21_v4  ;;  %v72_v10 = vmul.f32 %v237_v1, %v56_v5  ;;  %v23_v12 = vld [vmem:[%s388_s0 + $0x18] sm:$0xff]  ;;  %v41_v14 = vmul.f32 %v237_v1, %v22_v6  ;;  %v25_v20 = vld [vmem:[%s388_s0 + $0x28] sm:$0xff] }
   0x4   :  { %v245_v3 = vld [vmem:[%s391_s3] ss:$0 sm:$0xff]  ;;  %v71_v8 = vmul.f32 %v237_v1, %v55_v2  ;;  %v58_v13 = vld [vmem:[%s389_s1 + $0x18] sm:$0xff]  ;;  %v73_v15 = vmul.f32 %v237_v1, %v57_v11  ;;  %v42_v16 = vmul.f32 %v237_v1, %v23_v12  ;;  %v60_v25 = vld [vmem:[%s389_s1 + $0x28] sm:$0xff]  ;;  %v44_v30 = vmul.f32 %v237_v1, %v25_v20 }
   0x5   :  { %v74_v17 = vmul.f32 %v237_v1, %v58_v13  ;;  %v24_v18 = vld [vmem:[%s388_s0 + $0x20] sm:$0xff]  ;;  %v88_v22 = vmax.f32 %v40_v9, %v72_v10  ;;  %v26_v26 = vld [vmem:[%s388_s0 + $0x30] sm:$0xff]  ;;  %v76_v31 = vmul.f32 %v237_v1, %v60_v25  ;;  %v27_v32 = vld [vmem:[%s388_s0 + $0x38] sm:$0xff] }
   0x6   :  { %v59_v19 = vld [vmem:[%s389_s1 + $0x20] sm:$0xff]  ;;  %v87_v21 = vmax.f32 %v39_v7, %v71_v8  ;;  %v43_v23 = vmul.f32 %v237_v1, %v24_v18  ;;  %v61_v27 = vld [vmem:[%s389_s1 + $0x30] sm:$0xff]  ;;  %v89_v28 = vmax.f32 %v41_v14, %v73_v15  ;;  %v45_v36 = vmul.f32 %v237_v1, %v26_v26  ;;  %v62_v41 = vld [vmem:[%s389_s1 + $0x38] sm:$0xff] }
   0x7   :  { %v75_v24 = vmul.f32 %v237_v1, %v59_v19  ;;  %v90_v29 = vmax.f32 %v42_v16, %v74_v17  ;;  %v107_v34 = vadd.f32 %v245_v3, %v88_v22  ;;  %v92_v39 = vmax.f32 %v44_v30, %v76_v31  ;;  %v28_v42 = vld [vmem:[%s388_s0 + $0x40] sm:$0xff]  ;;  %v29_v48 = vld [vmem:[%s388_s0 + $0x48] sm:$0xff]  ;;  %v30_v54 = vld [vmem:[%s388_s0 + $0x50] sm:$0xff] }
   0x8   :  { %v106_v33 = vadd.f32 %v245_v3, %v87_v21  ;;  %v108_v37 = vadd.f32 %v245_v3, %v89_v28  ;;  %v77_v40 = vmul.f32 %v237_v1, %v61_v27  ;;  %v63_v43 = vld [vmem:[%s389_s1 + $0x40] sm:$0xff]  ;;  %v46_v47 = vmul.f32 %v237_v1, %v27_v32  ;;  %v64_v49 = vld [vmem:[%s389_s1 + $0x48] sm:$0xff]  ;;  %v65_v55 = vld [vmem:[%s389_s1 + $0x50] sm:$0xff] }
   0x9   :  { %v91_v35 = vmax.f32 %v43_v23, %v75_v24  ;;  %v109_v38 = vadd.f32 %v245_v3, %v90_v29  ;;  %v123_v45 = vmax.f32 %v107_v34, 0.0  ;;  %v111_v52 = vadd.f32 %v245_v3, %v92_v39  ;;  %v31_v60 = vld [vmem:[%s388_s0 + $0x58] sm:$0xff]  ;;  %v32_v4 = vld [vmem:[%s388_s0 + $0x60] sm:$0xff] }
   0xa   :  { %v122_v44 = vmax.f32 %v106_v33, 0.0  ;;  %v124_v50 = vmax.f32 %v108_v37, 0.0  ;;  %v93_v53 = vmax.f32 %v45_v36, %v77_v40  ;;  %v78_v57 = vmul.f32 %v237_v1, %v62_v41  ;;  %v66_v61 = vld [vmem:[%s389_s1 + $0x58] sm:$0xff] }
   0xb   :  { %v110_v46 = vadd.f32 %v245_v3, %v91_v35  ;;  %v125_v51 = vmax.f32 %v109_v38, 0.0  ;;  %v47_v58 = vmul.f32 %v237_v1, %v28_v42  ;;  %v79_v59 = vmul.f32 %v237_v1, %v63_v43  ;;  %139 = vst [vmem:[#allocation2 + $0x8] sm:$0xff] %v123_v45 }
   0xc   :  { %138 = vst [vmem:[#allocation2] sm:$0xff] %v122_v44  ;;  %v127_v62 = vmax.f32 %v111_v52, 0.0  ;;  %v112_v63 = vadd.f32 %v245_v3, %v93_v53  ;;  %v48_v0 = vmul.f32 %v237_v1, %v29_v48  ;;  %v80_v2 = vmul.f32 %v237_v1, %v64_v49 }
   0xd   :  { %v126_v56 = vmax.f32 %v110_v46, 0.0 }
   0xe   :  { %9 = vsyncpa [#allocation3], 0  ;;  %140 = vst [vmem:[#allocation2 + $0x10] sm:$0xff] %v124_v50  ;;  %v94_v5 = vmax.f32 %v46_v47, %v78_v57  ;;  %v95_v6 = vmax.f32 %v47_v58, %v79_v59  ;;  %v49_v7 = vmul.f32 %v237_v1, %v30_v54  ;;  %v81_v8 = vmul.f32 %v237_v1, %v65_v55  ;;  %v67_v9 = vld [vmem:[%s389_s1 + $0x60] sm:$0xff]  ;;  %v33_v10 = vld [vmem:[%s388_s0 + $0x68] sm:$0xff]  ;;  %s160_s3 = sshll.u32 %s392_s4, 4  ;;  %s161_s3 = int_to_ptr.hbm [resolvable:$true] %s160_s3 }
   0xf   :  { %141 = vst [vmem:[#allocation2 + $0x18] sm:$0xff] %v125_v51  ;;  %v128_v11 = vmax.f32 %v112_v63, 0.0  ;;  %v96_v12 = vmax.f32 %v48_v0, %v80_v2  ;;  %v50_v13 = vmul.f32 %v237_v1, %v31_v60  ;;  %v82_v14 = vmul.f32 %v237_v1, %v66_v61  ;;  %v68_v15 = vld [vmem:[%s389_s1 + $0x68] sm:$0xff]  ;;  %v34_v20 = vld [vmem:[%s388_s0 + $0x70] sm:$0xff]  ;;  %v35_v26 = vld [vmem:[%s388_s0 + $0x78] sm:$0xff]  ;;  %s203_s0 = smov [#allocation2]  }
  0x10   :  { %142 = vst [vmem:[#allocation2 + $0x20] sm:$0xff] %v126_v56  ;;  %v113_v16 = vadd.f32 %v245_v3, %v94_v5  ;;  %v114_v17 = vadd.f32 %v245_v3, %v95_v6  ;;  %v97_v18 = vmax.f32 %v49_v7, %v81_v8  ;;  %v51_v19 = vmul.f32 %v237_v1, %v32_v4  ;;  %v69_v25 = vld [vmem:[%s389_s1 + $0x70] sm:$0xff]  ;;  %v70_v31 = vld [vmem:[%s389_s1 + $0x78] sm:$0xff]  ;;  %s158_s1 = sshll.u32 %s203_s0, 4  ;;  %s204_s28 = smov 128   ;;  %s159_s1 = int_to_ptr.vmem [resolvable:$true] %s158_s1 }
  0x11   :  { %143 = vst [vmem:[#allocation2 + $0x28] sm:$0xff] %v127_v62  ;;  %v115_v21 = vadd.f32 %v245_v3, %v96_v12  ;;  %v98_v22 = vmax.f32 %v50_v13, %v82_v14  ;;  %v83_v23 = vmul.f32 %v237_v1, %v67_v9  ;;  %v52_v24 = vmul.f32 %v237_v1, %v33_v10  ;;  %s205_s29 = smov 8  }
  0x12   :  { %144 = vst [vmem:[#allocation2 + $0x30] sm:$0xff] %v128_v11  ;;  %v129_v27 = vmax.f32 %v113_v16, 0.0  ;;  %v130_v28 = vmax.f32 %v114_v17, 0.0  ;;  %v116_v29 = vadd.f32 %v245_v3, %v97_v18  ;;  %v84_v30 = vmul.f32 %v237_v1, %v68_v15 }
  0x13   :  { %v131_v32 = vmax.f32 %v115_v21, 0.0  ;;  %v117_v33 = vadd.f32 %v245_v3, %v98_v22  ;;  %v99_v34 = vmax.f32 %v51_v19, %v83_v23  ;;  %v53_v35 = vmul.f32 %v237_v1, %v34_v20 }
  0x14   :  { %145 = vst [vmem:[#allocation2 + $0x38] sm:$0xff] %v129_v27  ;;  %v132_v36 = vmax.f32 %v116_v29, 0.0  ;;  %v100_v37 = vmax.f32 %v52_v24, %v84_v30  ;;  %v85_v38 = vmul.f32 %v237_v1, %v69_v25  ;;  %v54_v39 = vmul.f32 %v237_v1, %v35_v26 }
  0x15   :  { %146 = vst [vmem:[#allocation2 + $0x40] sm:$0xff] %v130_v28  ;;  %v133_v40 = vmax.f32 %v117_v33, 0.0  ;;  %v118_v41 = vadd.f32 %v245_v3, %v99_v34  ;;  %v86_v42 = vmul.f32 %v237_v1, %v70_v31 }
  0x16   :  { %147 = vst [vmem:[#allocation2 + $0x48] sm:$0xff] %v131_v32  ;;  %v119_v43 = vadd.f32 %v245_v3, %v100_v37  ;;  %v101_v44 = vmax.f32 %v53_v35, %v85_v38 }
  0x17   :  { %148 = vst [vmem:[#allocation2 + $0x50] sm:$0xff] %v132_v36  ;;  %v134_v45 = vmax.f32 %v118_v41, 0.0  ;;  %v102_v46 = vmax.f32 %v54_v39, %v86_v42 }
  0x18   :  { %149 = vst [vmem:[#allocation2 + $0x58] sm:$0xff] %v133_v40  ;;  %v135_v47 = vmax.f32 %v119_v43, 0.0  ;;  %v120_v48 = vadd.f32 %v245_v3, %v101_v44 }
  0x19   :  { %150 = vst [vmem:[#allocation2 + $0x60] sm:$0xff] %v134_v45  ;;  %v121_v1 = vadd.f32 %v245_v3, %v102_v46 }
  0x1a   :  { %151 = vst [vmem:[#allocation2 + $0x68] sm:$0xff] %v135_v47  ;;  %v136_v49 = vmax.f32 %v120_v48, 0.0 }
  0x1b   :  { %v137_v50 = vmax.f32 %v121_v1, 0.0 }
  0x1c   :  { %152 = vst [vmem:[#allocation2 + $0x70] sm:$0xff] %v136_v49 }
  0x1d   :  { %153 = vst [vmem:[#allocation2 + $0x78] sm:$0xff] %v137_v50 }
  0x1e   :  { %166 = dma.vmem_to_hbm [thread:$0]  %s159_s1, 2048, %s161_s3, [#allocation3], %s204_s28, %s204_s28, %s205_s29  }
  0x1f   :  { %201 = dma.done.wait [#allocation3], 2048  }
  0x20   :  { %202 = vsyncadd [#allocation3], 4294965248 }
  0x21   :  { %171 = vsyncpa [#allocation3], 1 }

// kernel: reslayer_forward.2
= control target key start
LH: loop header
LB: loop body
LE: loop exit
PB: predicated region body
PF: predicated region fallthrough
CT: control target
= control target key end

     0   :  { %s1032_s15 = smov 0   ;;  %s1034_s16 = smov 0   ;;  %s1336_s0 = inlined_call_operand.vmem [shape: bf16[8,128,128], index: 0, kind: input, shape index: {}]   ;;  %s1337_s1 = inlined_call_operand.vmem [shape: bf16[128,128], index: 1, kind: input, shape index: {}]   ;;  %s1338_s2 = inlined_call_operand.vmem [shape: f32[128,128], index: 2, kind: output, shape index: {0}]   ;;  %s1339_s3 = inlined_call_operand.vmem [shape: f32[128,128], index: 3, kind: output, shape index: {1}]   ;;  %s1340_s4 = inlined_call_operand.vmem [shape: f32[1,8,128], index: 4, kind: output, shape index: {2}]  }
   0x1   :  { %s1036_s17 = smov 0  }
   0x2 LB: > { %s24_s18 = sadd.s32 1, %s1000_s16  ;;  %p838_p0 = scmp.ge.s32.totalorder %s1004_s17, 1  ;;  %s1004_s17 = sphi %s1036_s17, %s15_s17   ;;  %s1000_s16 = sphi %s1034_s16, %s1342_s16   ;;  %s996_s15 = sphi %s1032_s15, %s1341_s15  }
   0x3   : > { %p25_p1 = scmp.ge.s32.totalorder %s24_s18, 8  ;;  %p186_p2 = scmp.lt.s32.totalorder %s1004_s17, 9 }
   0x5   : > { %s1344_s18 = smov (%p25_p1, %s24_s18), 0  ;;  %p187_p3 = pnand %p838_p0, %p186_p2 }
   0x6   : > { %p226_p4 = scmp.lt.s32.totalorder (!%p187_p3), %s996_s15, 7  ;;  %p905_p5 = scmp.ne.s32.totalorder (!%p187_p3), %s996_s15, 0 }
   0x7   : > { %190 = sbr.rel (%p187_p3) target bundleno = 358 (0x166), region = 28 }
   0xc   : > { %v931_v0 = vld [vmem:[%s1337_s1 + $0x38] sm:$0xff]  ;;  %v930_v1 = vld [vmem:[%s1337_s1 + $0x30] sm:$0xff]  ;;  %v929_v2 = vld [vmem:[%s1337_s1 + $0x28] sm:$0xff]  ;;  %s227_s5 = scalar_select %p226_p4, %s996_s15, 7 }
   0xd   : > { %379 = vmatpush.bf16.msra.mxu0 %v931_v0  ;;  %932 = vmatpush.bf16.msra.mxu1 %v931_v0  ;;  %v928_v3 = vld [vmem:[%s1337_s1 + $0x20] sm:$0xff]  ;;  %v927_v4 = vld [vmem:[%s1337_s1 + $0x18] sm:$0xff]  ;;  %v926_v5 = vld [vmem:[%s1337_s1 + $0x10] sm:$0xff] }
   0xe   : > { %933 = vmatpush.bf16.msra.mxu2 %v931_v0  ;;  %934 = vmatpush.bf16.msra.mxu3 %v931_v0  ;;  %v925_v6 = vld [vmem:[%s1337_s1 + $0x8] sm:$0xff]  ;;  %s915_s8 = sshll.u32 %s227_s5, 6  ;;  %v924_v7 = vld [vmem:[%s1337_s1] sm:$0xff] }
   0xf   : > { %s233_s13 = scalar_lea.vmem %s1336_s0, %s915_s8 }
  0x10   : > { %v916_v8 = vld [vmem:[%s233_s13] sm:$0xff]  ;;  %v918_v9 = vld [vmem:[%s233_s13 + $0x10] sm:$0xff]  ;;  %v917_v12 = vld [vmem:[%s233_s13 + $0x8] sm:$0xff] }
  0x11   : > { %380 = vmatpush.bf16.msra.mxu0 %v930_v1  ;;  %935 = vmatpush.bf16.msra.mxu1 %v930_v1  ;;  %v920_v10 = vld [vmem:[%s233_s13 + $0x20] sm:$0xff]  ;;  %v922_v11 = vld [vmem:[%s233_s13 + $0x30] sm:$0xff]  ;;  %v919_v13 = vld [vmem:[%s233_s13 + $0x18] sm:$0xff] }
  0x12   : > { %936 = vmatpush.bf16.msra.mxu2 %v930_v1  ;;  %937 = vmatpush.bf16.msra.mxu3 %v930_v1  ;;  %v921_v14 = vld [vmem:[%s233_s13 + $0x28] sm:$0xff]  ;;  %v923_v15 = vld [vmem:[%s233_s13 + $0x38] sm:$0xff] }
  0x15   : > { %381 = vmatpush.bf16.msra.mxu0 %v929_v2  ;;  %938 = vmatpush.bf16.msra.mxu1 %v929_v2 }
  0x16   : > { %939 = vmatpush.bf16.msra.mxu2 %v929_v2  ;;  %940 = vmatpush.bf16.msra.mxu3 %v929_v2 }
  0x19   : > { %382 = vmatpush.bf16.msra.mxu0 %v928_v3  ;;  %941 = vmatpush.bf16.msra.mxu1 %v928_v3 }
  0x1a   : > { %942 = vmatpush.bf16.msra.mxu2 %v928_v3  ;;  %943 = vmatpush.bf16.msra.mxu3 %v928_v3 }
  0x1d   : > { %383 = vmatpush.bf16.msra.mxu0 %v927_v4  ;;  %944 = vmatpush.bf16.msra.mxu1 %v927_v4 }
  0x1e   : > { %945 = vmatpush.bf16.msra.mxu2 %v927_v4  ;;  %946 = vmatpush.bf16.msra.mxu3 %v927_v4 }
  0x21   : > { %384 = vmatpush.bf16.msra.mxu0 %v926_v5  ;;  %947 = vmatpush.bf16.msra.mxu1 %v926_v5 }
  0x22   : > { %948 = vmatpush.bf16.msra.mxu2 %v926_v5  ;;  %949 = vmatpush.bf16.msra.mxu3 %v926_v5 }
  0x25   : > { %385 = vmatpush.bf16.msra.mxu0 %v925_v6  ;;  %950 = vmatpush.bf16.msra.mxu1 %v925_v6 }
  0x26   : > { %951 = vmatpush.bf16.msra.mxu2 %v925_v6  ;;  %952 = vmatpush.bf16.msra.mxu3 %v925_v6 }
  0x29   : > { %386 = vmatpush.bf16.msra.mxu0 %v924_v7  ;;  %953 = vmatpush.bf16.msra.mxu1 %v924_v7 }
  0x2a   : > { %954 = vmatpush.bf16.msra.mxu2 %v924_v7  ;;  %955 = vmatpush.bf16.msra.mxu3 %v924_v7 }
  0x2c   : > { %387 = vmatmul.bf16.vlgmr.msra.gmra.mxu0 %v916_v8  ;;  %397 = vmatmul.bf16.vlgmr.msra.gmra.mxu1 %v918_v9 }
  0x2d   : > { %407 = vmatmul.bf16.vlgmr.msra.gmra.mxu2 %v920_v10  ;;  %417 = vmatmul.bf16.vlgmr.msra.gmra.mxu3 %v922_v11 }
  0x3c   : > { %392 = vmatmul.bf16.gmra.mxu0 %v917_v12  ;;  %402 = vmatmul.bf16.gmra.mxu1 %v919_v13 }
  0x3d   : > { %412 = vmatmul.bf16.gmra.mxu2 %v921_v14  ;;  %422 = vmatmul.bf16.gmra.mxu3 %v923_v15 }
  0xa9   : > { %v1081_v16 = vpop.f32.mrf.mxu0  ;;  %v1083_v17 = vpop.f32.mrf.mxu1 }
  0xb0   : > { %v1085_v18 = vpop.f32.mrf.mxu2  ;;  %v1087_v19 = vpop.f32.mrf.mxu3 }
  0xb1   : > { %v1089_v20 = vpop.f32.mrf.mxu0  ;;  %v1091_v21 = vpop.f32.mrf.mxu1 }
  0xb8   : > { %v1093_v22 = vpop.f32.mrf.mxu2  ;;  %v1095_v23 = vpop.f32.mrf.mxu3 }
  0xb9   : > { %v1097_v24 = vpop.f32.mrf.mxu0  ;;  %v1099_v25 = vpop.f32.mrf.mxu1 }
  0xc0   : > { %v1101_v26 = vpop.f32.mrf.mxu2  ;;  %v1103_v27 = vpop.f32.mrf.mxu3 }
  0xc1   : > { %v1105_v28 = vpop.f32.mrf.mxu0  ;;  %v1107_v29 = vpop.f32.mrf.mxu1 }
  0xc4   : > { %431 = sbr.rel (%p905_p5) target bundleno = 235 (0xeb), region = 32 }
  0xc8   : > { %v1109_v30 = vpop.f32.mrf.mxu2  ;;  %v1111_v31 = vpop.f32.mrf.mxu3 }
  0xc9   : > { %432 = vst [vmem:[#allocation2 + $0x30] sm:$0xff] %v1081_v16  ;;  %v1006_v32 = vmov 0.0  }
  0xca   : > { %433 = vst [vmem:[#allocation2] sm:$0xff] %v1089_v20 }
  0xcb   : > { %434 = vst [vmem:[#allocation2 + $0x58] sm:$0xff] %v1097_v24 }
  0xcc   : > { %435 = vst [vmem:[#allocation2 + $0x18] sm:$0xff] %v1105_v28 }
  0xcd   : > { %436 = vst [vmem:[#allocation2 + $0x50] sm:$0xff] %v1083_v17 }
  0xce   : > { %437 = vst [vmem:[#allocation2 + $0x68] sm:$0xff] %v1091_v21 }
  0xcf   : > { %438 = vst [vmem:[#allocation2 + $0x8] sm:$0xff] %v1099_v25 }
  0xd0   : > { %439 = vst [vmem:[#allocation2 + $0x48] sm:$0xff] %v1107_v29 }
  0xd1   : > { %440 = vst [vmem:[#allocation2 + $0x40] sm:$0xff] %v1085_v18 }
  0xd2   : > { %441 = vst [vmem:[#allocation2 + $0x20] sm:$0xff] %v1093_v22 }
  0xd3   : > { %442 = vst [vmem:[#allocation2 + $0x10] sm:$0xff] %v1101_v26 }
  0xd4   : > { %443 = vst [vmem:[#allocation2 + $0x38] sm:$0xff] %v1109_v30 }
  0xd5   : > { %444 = vst [vmem:[#allocation2 + $0x60] sm:$0xff] %v1087_v19 }
  0xd6   : > { %445 = vst [vmem:[#allocation2 + $0x70] sm:$0xff] %v1095_v23 }
  0xd7   : > { %446 = vst [vmem:[#allocation2 + $0x78] sm:$0xff] %v1103_v27 }
  0xd8   : > { %447 = vst [vmem:[#allocation2 + $0x28] sm:$0xff] %v1111_v31 }
  0xd9   : > { %448 = vst [vmem:[#allocation3 + $0x28] sm:$0xff] %v1081_v16 }
  0xda   : > { %449 = vst [vmem:[#allocation3 + $0x68] sm:$0xff] %v1089_v20 }
  0xdb   : > { %450 = vst [vmem:[#allocation3 + $0x10] sm:$0xff] %v1097_v24 }
  0xdc   : > { %451 = vst [vmem:[#allocation3 + $0x40] sm:$0xff] %v1105_v28 }
  0xdd   : > { %452 = vst [vmem:[#allocation3 + $0x48] sm:$0xff] %v1083_v17 }
  0xde   : > { %453 = vst [vmem:[#allocation3 + $0x30] sm:$0xff] %v1091_v21 }
  0xdf   : > { %454 = vst [vmem:[#allocation3 + $0x70] sm:$0xff] %v1099_v25 }
  0xe0   : > { %455 = vst [vmem:[#allocation3 + $0x38] sm:$0xff] %v1107_v29 }
  0xe1   : > { %456 = vst [vmem:[#allocation3 + $0x20] sm:$0xff] %v1085_v18 }
  0xe2   : > { %457 = vst [vmem:[#allocation3 + $0x78] sm:$0xff] %v1093_v22 }
  0xe3   : > { %458 = vst [vmem:[#allocation3 + $0x18] sm:$0xff] %v1101_v26 }
  0xe4   : > { %459 = vst [vmem:[#allocation3 + $0x58] sm:$0xff] %v1109_v30 }
  0xe5   : > { %460 = vst [vmem:[#allocation3] sm:$0xff] %v1087_v19 }
  0xe6   : > { %461 = vst [vmem:[#allocation3 + $0x8] sm:$0xff] %v1095_v23 }
  0xe7   : > { %462 = vst [vmem:[#allocation3 + $0x60] sm:$0xff] %v1103_v27 }
  0xe8   : > { %463 = vst [vmem:[#allocation3 + $0x50] sm:$0xff] %v1111_v31 }
  0xe9   : > { %464 = vst [vmem:[#allocation4] sm:$0x1] %v1006_v32 }
  0xea   : > { %465 = vst [vmem:[#allocation5] sm:$0x1] %v1006_v32 }
  0xeb PF: > { %p906_p6 = scmp.le.s32.totalorder %s996_s15, 0 }
  0xed   : > { %469 = sbr.rel (%p906_p6) target bundleno = 277 (0x115), region = 36 }
  0xf2   : > { %v470_v33 = vld [vmem:[#allocation2 + $0x30] sm:$0xff]  ;;  %v471_v34 = vld [vmem:[#allocation2] sm:$0xff]  ;;  %v472_v35 = vld [vmem:[#allocation2 + $0x58] sm:$0xff] }
  0xf3   : > { %v486_v36 = vmax.f32 %v470_v33, %v1081_v16  ;;  %v487_v37 = vmax.f32 %v471_v34, %v1089_v20  ;;  %v488_v38 = vmax.f32 %v472_v35, %v1097_v24  ;;  %v473_v39 = vld [vmem:[#allocation2 + $0x18] sm:$0xff]  ;;  %v474_v40 = vld [vmem:[#allocation2 + $0x50] sm:$0xff]  ;;  %v475_v41 = vld [vmem:[#allocation2 + $0x68] sm:$0xff] }
  0xf4   : > { %v489_v42 = vmax.f32 %v473_v39, %v1105_v28  ;;  %v476_v43 = vld [vmem:[#allocation2 + $0x8] sm:$0xff]  ;;  %v490_v44 = vmax.f32 %v474_v40, %v1083_v17  ;;  %v491_v46 = vmax.f32 %v475_v41, %v1091_v21  ;;  %v478_v47 = vld [vmem:[#allocation2 + $0x40] sm:$0xff]  ;;  %v480_v51 = vld [vmem:[#allocation2 + $0x10] sm:$0xff] }
  0xf5   : > { %502 = vst [vmem:[#allocation2 + $0x30] sm:$0xff] %v486_v36  ;;  %v477_v45 = vld [vmem:[#allocation2 + $0x48] sm:$0xff]  ;;  %v492_v48 = vmax.f32 %v476_v43, %v1099_v25  ;;  %v479_v49 = vld [vmem:[#allocation2 + $0x20] sm:$0xff]  ;;  %v494_v52 = vmax.f32 %v478_v47, %v1085_v18  ;;  %v481_v53 = vld [vmem:[#allocation2 + $0x38] sm:$0xff]  ;;  %v496_v56 = vmax.f32 %v480_v51, %v1101_v26 }
  0xf6   : > { %503 = vst [vmem:[#allocation2] sm:$0xff] %v487_v37  ;;  %v493_v50 = vmax.f32 %v477_v45, %v1107_v29  ;;  %v495_v54 = vmax.f32 %v479_v49, %v1093_v22  ;;  %v482_v55 = vld [vmem:[#allocation2 + $0x60] sm:$0xff]  ;;  %v483_v57 = vld [vmem:[#allocation2 + $0x70] sm:$0xff]  ;;  %v497_v58 = vmax.f32 %v481_v53, %v1109_v30  ;;  %v484_v59 = vld [vmem:[#allocation2 + $0x78] sm:$0xff] }
  0xf7   : > { %504 = vst [vmem:[#allocation2 + $0x58] sm:$0xff] %v488_v38  ;;  %v498_v60 = vmax.f32 %v482_v55, %v1087_v19  ;;  %v485_v61 = vld [vmem:[#allocation2 + $0x28] sm:$0xff]  ;;  %v499_v62 = vmax.f32 %v483_v57, %v1095_v23  ;;  %v500_v0 = vmax.f32 %v484_v59, %v1103_v27  ;;  %v520_v3 = vld [vmem:[#allocation3 + $0x10] sm:$0xff]  ;;  %v521_v5 = vld [vmem:[#allocation3 + $0x40] sm:$0xff] }
  0xf8   : > { %505 = vst [vmem:[#allocation2 + $0x18] sm:$0xff] %v489_v42  ;;  %v518_v63 = vld [vmem:[#allocation3 + $0x28] sm:$0xff]  ;;  %v501_v2 = vmax.f32 %v485_v61, %v1111_v31  ;;  %v536_v8 = vmin.f32 %v520_v3, %v1097_v24  ;;  %v523_v9 = vld [vmem:[#allocation3 + $0x30] sm:$0xff]  ;;  %v537_v10 = vmin.f32 %v521_v5, %v1105_v28  ;;  %v525_v13 = vld [vmem:[#allocation3 + $0x38] sm:$0xff] }
  0xf9   : > { %506 = vst [vmem:[#allocation2 + $0x50] sm:$0xff] %v490_v44  ;;  %v519_v1 = vld [vmem:[#allocation3 + $0x68] sm:$0xff]  ;;  %v534_v4 = vmin.f32 %v518_v63, %v1081_v16  ;;  %v524_v11 = vld [vmem:[#allocation3 + $0x70] sm:$0xff]  ;;  %v539_v14 = vmin.f32 %v523_v9, %v1091_v21  ;;  %v526_v15 = vld [vmem:[#allocation3 + $0x20] sm:$0xff]  ;;  %v541_v34 = vmin.f32 %v525_v13, %v1107_v29 }
  0xfa   : > { %507 = vst [vmem:[#allocation2 + $0x68] sm:$0xff] %v491_v46  ;;  %v535_v6 = vmin.f32 %v519_v1, %v1089_v20  ;;  %v522_v7 = vld [vmem:[#allocation3 + $0x48] sm:$0xff]  ;;  %v540_v32 = vmin.f32 %v524_v11, %v1099_v25  ;;  %v527_v33 = vld [vmem:[#allocation3 + $0x78] sm:$0xff]  ;;  %v542_v36 = vmin.f32 %v526_v15, %v1085_v18  ;;  %v530_v39 = vld [vmem:[#allocation3] sm:$0xff] }
  0xfb   : > { %508 = vst [vmem:[#allocation2 + $0x8] sm:$0xff] %v492_v48  ;;  %v538_v12 = vmin.f32 %v522_v7, %v1083_v17  ;;  %v528_v35 = vld [vmem:[#allocation3 + $0x18] sm:$0xff]  ;;  %v543_v38 = vmin.f32 %v527_v33, %v1093_v22  ;;  %v531_v41 = vld [vmem:[#allocation3 + $0x8] sm:$0xff]  ;;  %v532_v43 = vld [vmem:[#allocation3 + $0x60] sm:$0xff]  ;;  %v546_v44 = vmin.f32 %v530_v39, %v1087_v19 }
  0xfc   : > { %509 = vst [vmem:[#allocation2 + $0x48] sm:$0xff] %v493_v50  ;;  %v529_v37 = vld [vmem:[#allocation3 + $0x58] sm:$0xff]  ;;  %v544_v40 = vmin.f32 %v528_v35, %v1101_v26  ;;  %v533_v45 = vld [vmem:[#allocation3 + $0x50] sm:$0xff]  ;;  %v547_v46 = vmin.f32 %v531_v41, %v1095_v23  ;;  %v548_v47 = vmin.f32 %v532_v43, %v1103_v27 }
  0xfd   : > { %510 = vst [vmem:[#allocation2 + $0x40] sm:$0xff] %v494_v52  ;;  %v545_v42 = vmin.f32 %v529_v37, %v1109_v30  ;;  %v549_v48 = vmin.f32 %v533_v45, %v1111_v31 }
  0xfe   : > { %511 = vst [vmem:[#allocation2 + $0x20] sm:$0xff] %v495_v54 }
  0xff   : > { %512 = vst [vmem:[#allocation2 + $0x10] sm:$0xff] %v496_v56 }
 0x100   : > { %513 = vst [vmem:[#allocation2 + $0x38] sm:$0xff] %v497_v58 }
 0x101   : > { %514 = vst [vmem:[#allocation2 + $0x60] sm:$0xff] %v498_v60 }
 0x102   : > { %515 = vst [vmem:[#allocation2 + $0x70] sm:$0xff] %v499_v62 }
 0x103   : > { %516 = vst [vmem:[#allocation2 + $0x78] sm:$0xff] %v500_v0 }
 0x104   : > { %517 = vst [vmem:[#allocation2 + $0x28] sm:$0xff] %v501_v2 }
 0x105   : > { %550 = vst [vmem:[#allocation3 + $0x28] sm:$0xff] %v534_v4 }
 0x106   : > { %551 = vst [vmem:[#allocation3 + $0x68] sm:$0xff] %v535_v6 }
 0x107   : > { %552 = vst [vmem:[#allocation3 + $0x10] sm:$0xff] %v536_v8 }
 0x108   : > { %553 = vst [vmem:[#allocation3 + $0x40] sm:$0xff] %v537_v10 }
 0x109   : > { %554 = vst [vmem:[#allocation3 + $0x48] sm:$0xff] %v538_v12 }
 0x10a   : > { %555 = vst [vmem:[#allocation3 + $0x30] sm:$0xff] %v539_v14 }
 0x10b   : > { %556 = vst [vmem:[#allocation3 + $0x70] sm:$0xff] %v540_v32 }
 0x10c   : > { %557 = vst [vmem:[#allocation3 + $0x38] sm:$0xff] %v541_v34 }
 0x10d   : > { %558 = vst [vmem:[#allocation3 + $0x20] sm:$0xff] %v542_v36 }
 0x10e   : > { %559 = vst [vmem:[#allocation3 + $0x78] sm:$0xff] %v543_v38 }
 0x10f   : > { %560 = vst [vmem:[#allocation3 + $0x18] sm:$0xff] %v544_v40 }
 0x110   : > { %561 = vst [vmem:[#allocation3 + $0x58] sm:$0xff] %v545_v42 }
 0x111   : > { %562 = vst [vmem:[#allocation3] sm:$0xff] %v546_v44 }
 0x112   : > { %563 = vst [vmem:[#allocation3 + $0x8] sm:$0xff] %v547_v46 }
 0x113   : > { %564 = vst [vmem:[#allocation3 + $0x60] sm:$0xff] %v548_v47 }
 0x114   : > { %565 = vst [vmem:[#allocation3 + $0x50] sm:$0xff] %v549_v48 }
 0x115 PF: > { %v567_v49 = vadd.f32 %v1089_v20, %v1081_v16  ;;  %v591_v50 = vmul.f32 %v1081_v16, %v1081_v16  ;;  %v592_v51 = vmul.f32 %v1089_v20, %v1089_v20  ;;  %v593_v53 = vmul.f32 %v1097_v24, %v1097_v24  ;;  %v566_v41 = vld [vmem:[#allocation4] sm:$0x1]  ;;  %v590_v45 = vld [vmem:[#allocation5] sm:$0x1]  ;;  %p907_p7 = scmp.ne.s32.totalorder %s996_s15, 7 }
 0x116   : > { %v594_v55 = vmul.f32 %v1105_v28, %v1105_v28  ;;  %v595_v58 = vmul.f32 %v1083_v17, %v1083_v17  ;;  %v596_v20 = vmul.f32 %v1091_v21, %v1091_v21  ;;  %v597_v61 = vmul.f32 %v1099_v25, %v1099_v25 }
 0x117   : > { %v568_v52 = vadd.f32 %v567_v49, %v1097_v24  ;;  %v607_v56 = vadd.f32 %v592_v51, %v591_v50  ;;  %v598_v63 = vmul.f32 %v1107_v29, %v1107_v29  ;;  %v599_v1 = vmul.f32 %v1085_v18, %v1085_v18 }
 0x118   : > { %v600_v3 = vmul.f32 %v1093_v22, %v1093_v22  ;;  %v601_v5 = vmul.f32 %v1101_v26, %v1101_v26  ;;  %v602_v7 = vmul.f32 %v1109_v30, %v1109_v30  ;;  %v603_v9 = vmul.f32 %v1087_v19, %v1087_v19 }
 0x119   : > { %v569_v54 = vadd.f32 %v568_v52, %v1105_v28  ;;  %v608_v16 = vadd.f32 %v607_v56, %v593_v53  ;;  %v604_v11 = vmul.f32 %v1095_v23, %v1095_v23  ;;  %v605_v13 = vmul.f32 %v1103_v27, %v1103_v27 }
 0x11a   : > { %v606_v15 = vmul.f32 %v1111_v31, %v1111_v31 }
 0x11b   : > { %v570_v57 = vadd.f32 %v569_v54, %v1083_v17  ;;  %v609_v60 = vadd.f32 %v608_v16, %v594_v55 }
 0x11d   : > { %v571_v59 = vadd.f32 %v570_v57, %v1091_v21  ;;  %v610_v62 = vadd.f32 %v609_v60, %v595_v58 }
 0x11f   : > { %v572_v24 = vadd.f32 %v571_v59, %v1099_v25  ;;  %v611_v0 = vadd.f32 %v610_v62, %v596_v20 }
 0x121   : > { %v573_v28 = vadd.f32 %v572_v24, %v1107_v29  ;;  %v612_v2 = vadd.f32 %v611_v0, %v597_v61 }
 0x123   : > { %v574_v17 = vadd.f32 %v573_v28, %v1085_v18  ;;  %v613_v4 = vadd.f32 %v612_v2, %v598_v63 }
 0x125   : > { %v575_v21 = vadd.f32 %v574_v17, %v1093_v22  ;;  %v614_v6 = vadd.f32 %v613_v4, %v599_v1 }
 0x127   : > { %v576_v25 = vadd.f32 %v575_v21, %v1101_v26  ;;  %v615_v8 = vadd.f32 %v614_v6, %v600_v3 }
 0x129   : > { %v577_v29 = vadd.f32 %v576_v25, %v1109_v30  ;;  %v616_v10 = vadd.f32 %v615_v8, %v601_v5 }
 0x12b   : > { %v578_v18 = vadd.f32 %v577_v29, %v1087_v19  ;;  %v617_v12 = vadd.f32 %v616_v10, %v602_v7 }
 0x12d   : > { %v579_v22 = vadd.f32 %v578_v18, %v1095_v23  ;;  %v618_v14 = vadd.f32 %v617_v12, %v603_v9 }
 0x12f   : > { %v580_v26 = vadd.f32 %v579_v22, %v1103_v27  ;;  %v619_v32 = vadd.f32 %v618_v14, %v604_v11 }
 0x131   : > { %v581_v30 = vadd.f32 %v580_v26, %v1111_v31  ;;  %v620_v33 = vadd.f32 %v619_v32, %v605_v13 }
 0x133   : > { %v582_v19 = vrot.slane %v581_v30, 4  ;;  %v621_v35 = vadd.f32 %v620_v33, %v606_v15 }
 0x135   : > { %v583_v34 = vadd.f32 %v582_v19, %v581_v30  ;;  %v622_v37 = vrot.slane %v621_v35, 4 }
 0x137   : > { %v584_v36 = vrot.slane %v583_v34, 2  ;;  %v623_v38 = vadd.f32 %v622_v37, %v621_v35 }
 0x139   : > { %v585_v23 = vadd.f32 %v584_v36, %v583_v34  ;;  %v624_v40 = vrot.slane %v623_v38, 2 }
 0x13b   : > { %v586_v39 = vrot.slane %v585_v23, 1  ;;  %v625_v27 = vadd.f32 %v624_v40, %v623_v38 }
 0x13d   : > { %v587_v42 = vadd.f32 %v586_v39, %v585_v23  ;;  %v626_v44 = vrot.slane %v625_v27, 1 }
 0x13f   : > { %v588_v43 = vadd.f32 %v587_v42, %v566_v41  ;;  %v627_v46 = vadd.f32 %v626_v44, %v625_v27  ;;  %633 = sbr.rel (%p907_p7) target bundleno = 358 (0x166), region = 40 }
 0x141   : > { %589 = vst [vmem:[#allocation4] sm:$0x1] %v588_v43  ;;  %v628_v31 = vadd.f32 %v627_v46, %v590_v45 }
 0x143   : > { %629 = vst [vmem:[#allocation5] sm:$0x1] %v628_v31 }
 0x144   : > { %v634_v47 = vld [vmem:[#allocation2 + $0x30] sm:$0xff]  ;;  %v635_v48 = vld [vmem:[#allocation2] sm:$0xff]  ;;  %v636_v49 = vld [vmem:[#allocation2 + $0x58] sm:$0xff]  ;;  %vm703_vm0 = vcmask 1040384   ;;  %vm705_vm1 = vcmask 1041408  }
 0x145   : > { %650 = vst [vmem:[%s1338_s2] sm:$0xff] %v634_v47  ;;  %v637_v50 = vld [vmem:[#allocation2 + $0x18] sm:$0xff]  ;;  %v638_v51 = vld [vmem:[#allocation2 + $0x50] sm:$0xff]  ;;  %v639_v52 = vld [vmem:[#allocation2 + $0x68] sm:$0xff] }
 0x146   : > { %651 = vst [vmem:[%s1338_s2 + $0x8] sm:$0xff] %v635_v48  ;;  %v640_v53 = vld [vmem:[#allocation2 + $0x8] sm:$0xff]  ;;  %v642_v55 = vld [vmem:[#allocation2 + $0x40] sm:$0xff]  ;;  %v644_v57 = vld [vmem:[#allocation2 + $0x10] sm:$0xff] }
 0x147   : > { %652 = vst [vmem:[%s1338_s2 + $0x10] sm:$0xff] %v636_v49  ;;  %v641_v54 = vld [vmem:[#allocation2 + $0x48] sm:$0xff]  ;;  %v643_v56 = vld [vmem:[#allocation2 + $0x20] sm:$0xff]  ;;  %v645_v58 = vld [vmem:[#allocation2 + $0x38] sm:$0xff] }
 0x148   : > { %653 = vst [vmem:[%s1338_s2 + $0x18] sm:$0xff] %v637_v50  ;;  %v646_v16 = vld [vmem:[#allocation2 + $0x60] sm:$0xff]  ;;  %v647_v59 = vld [vmem:[#allocation2 + $0x70] sm:$0xff]  ;;  %v648_v20 = vld [vmem:[#allocation2 + $0x78] sm:$0xff] }
 0x149   : > { %654 = vst [vmem:[%s1338_s2 + $0x20] sm:$0xff] %v638_v51  ;;  %v649_v60 = vld [vmem:[#allocation2 + $0x28] sm:$0xff]  ;;  %v668_v62 = vld [vmem:[#allocation3 + $0x10] sm:$0xff]  ;;  %v669_v28 = vld [vmem:[#allocation3 + $0x40] sm:$0xff] }
 0x14a   : > { %655 = vst [vmem:[%s1338_s2 + $0x28] sm:$0xff] %v639_v52  ;;  %v666_v24 = vld [vmem:[#allocation3 + $0x28] sm:$0xff]  ;;  %v671_v0 = vld [vmem:[#allocation3 + $0x30] sm:$0xff]  ;;  %v673_v1 = vld [vmem:[#allocation3 + $0x38] sm:$0xff] }
 0x14b   : > { %656 = vst [vmem:[%s1338_s2 + $0x30] sm:$0xff] %v640_v53  ;;  %v667_v61 = vld [vmem:[#allocation3 + $0x68] sm:$0xff]  ;;  %v672_v17 = vld [vmem:[#allocation3 + $0x70] sm:$0xff]  ;;  %v674_v2 = vld [vmem:[#allocation3 + $0x20] sm:$0xff] }
 0x14c   : > { %657 = vst [vmem:[%s1338_s2 + $0x38] sm:$0xff] %v641_v54  ;;  %v670_v63 = vld [vmem:[#allocation3 + $0x48] sm:$0xff]  ;;  %v675_v21 = vld [vmem:[#allocation3 + $0x78] sm:$0xff]  ;;  %v981_v3 = vld [vmem:[#allocation5] ss:$0 sm:$0xff] }
 0x14d   : > { %658 = vst [vmem:[%s1338_s2 + $0x40] sm:$0xff] %v642_v55  ;;  %v676_v4 = vld [vmem:[#allocation3 + $0x18] sm:$0xff]  ;;  %v698_v25 = vld [vmem:[#allocation4] sm:$0x1]  ;;  %v679_v29 = vld [vmem:[#allocation3 + $0x8] sm:$0xff] }
 0x14e   : > { %659 = vst [vmem:[%s1338_s2 + $0x48] sm:$0xff] %v643_v56  ;;  %v677_v5 = vld [vmem:[#allocation3 + $0x58] sm:$0xff]  ;;  %v678_v6 = vld [vmem:[#allocation3] sm:$0xff]  ;;  %v704_v7 = vsel %vm703_vm0, %v698_v25, %v981_v3  ;;  %v681_v18 = vld [vmem:[#allocation3 + $0x50] sm:$0xff] }
 0x14f   : > { %660 = vst [vmem:[%s1338_s2 + $0x50] sm:$0xff] %v644_v57  ;;  %v680_v8 = vld [vmem:[#allocation3 + $0x60] sm:$0xff]  ;;  %v706_v9 = vsel %vm705_vm1, %v704_v7, 0.0 }
 0x150   : > { %661 = vst [vmem:[%s1338_s2 + $0x58] sm:$0xff] %v645_v58 }
 0x151   : > { %662 = vst [vmem:[%s1338_s2 + $0x60] sm:$0xff] %v646_v16 }
 0x152   : > { %663 = vst [vmem:[%s1338_s2 + $0x68] sm:$0xff] %v647_v59 }
 0x153   : > { %664 = vst [vmem:[%s1338_s2 + $0x70] sm:$0xff] %v648_v20 }
 0x154   : > { %665 = vst [vmem:[%s1338_s2 + $0x78] sm:$0xff] %v649_v60 }
 0x155   : > { %682 = vst [vmem:[%s1339_s3] sm:$0xff] %v666_v24 }
 0x156   : > { %683 = vst [vmem:[%s1339_s3 + $0x8] sm:$0xff] %v667_v61 }
 0x157   : > { %684 = vst [vmem:[%s1339_s3 + $0x10] sm:$0xff] %v668_v62 }
 0x158   : > { %685 = vst [vmem:[%s1339_s3 + $0x18] sm:$0xff] %v669_v28 }
 0x159   : > { %686 = vst [vmem:[%s1339_s3 + $0x20] sm:$0xff] %v670_v63 }
 0x15a   : > { %687 = vst [vmem:[%s1339_s3 + $0x28] sm:$0xff] %v671_v0 }
 0x15b   : > { %688 = vst [vmem:[%s1339_s3 + $0x30] sm:$0xff] %v672_v17 }
 0x15c   : > { %689 = vst [vmem:[%s1339_s3 + $0x38] sm:$0xff] %v673_v1 }
 0x15d   : > { %690 = vst [vmem:[%s1339_s3 + $0x40] sm:$0xff] %v674_v2 }
 0x15e   : > { %691 = vst [vmem:[%s1339_s3 + $0x48] sm:$0xff] %v675_v21 }
 0x15f   : > { %692 = vst [vmem:[%s1339_s3 + $0x50] sm:$0xff] %v676_v4 }
 0x160   : > { %693 = vst [vmem:[%s1339_s3 + $0x58] sm:$0xff] %v677_v5 }
 0x161   : > { %694 = vst [vmem:[%s1339_s3 + $0x60] sm:$0xff] %v678_v6 }
 0x162   : > { %695 = vst [vmem:[%s1339_s3 + $0x68] sm:$0xff] %v679_v29 }
 0x163   : > { %696 = vst [vmem:[%s1339_s3 + $0x70] sm:$0xff] %v680_v8 }
 0x164   : > { %697 = vst [vmem:[%s1339_s3 + $0x78] sm:$0xff] %v681_v18 }
 0x165   : > { %707 = vst [vmem:[%s1340_s4] sm:$0xff] %v706_v9 }
 0x166 PF: > { %s15_s17 = sadd.s32 1, %s1004_s17   ;;  %s1341_s15 = smov %s1000_s16 }
 0x167   : > { %p12_p8 = scmp.ge.s32.totalorder %s15_s17, 10   ;;  %s1342_s16 = smov %s1344_s18 }
 0x169   :  { %14 = sbr.rel (!%p12_p8) target bundleno = 2 (0x2), region = 94 }

</bundles_post_ra>
